<compile_context>
chip_gen: v6e
topology: v6e:2x2x1
jax: 0.10.0
libtpu: 0.0.40
codegen_flags: <defaults>
</compile_context>

<pallas_src>
import jax
import jax.numpy as jnp
from jax.experimental import pallas as pl
from jax.experimental.pallas import tpu as pltpu

HIDDEN = 768          # BERT hidden size (fc1 input)
FC1_OUT = 512
NUM_CLASSES = 2
DEFAULT_TILE_B = 1024  # batch tile; sweep 1024-2048 for large-B deployments


def _round_up(x, m):
    return ((x + m - 1) // m) * m


def _pick_tile(batch, tile_b):
    """Batch tile: big enough to amortize per-step overhead, but capped at
    ~ceil(B/2) so the grid has >=2 steps (v7x has 2 TensorCores)."""
    if batch <= 8:
        return batch  # single full block; block dims equal array dims
    half = _round_up(-(-batch // 2), 8)   # ceil(B/2) rounded to sublane multiple
    return max(8, min(tile_b, half))


def _head_kernel(x_ref, w1_ref, b1_ref, w2d_ref, b2d_ref, o_ref):
    # x:   [tb, 768] f32   (cast to bf16 in-kernel; avoids a wrapper HBM pass)
    # w1:  [768, 512] bf16   b1: [1, 512] f32
    # w2d: [512, 1]  bf16   (w2[:,1] - w2[:,0])   b2d: [1, 1] f32
    # o:   [tb, 2]   f32   log-probabilities
    x = x_ref[...].astype(jnp.bfloat16)

    # fc1 + ReLU: bf16 operands on the MXU, fp32 accumulate; bias/ReLU in fp32.
    h = jnp.dot(x, w1_ref[...], preferred_element_type=jnp.float32) + b1_ref[...]
    h = jnp.maximum(h, 0.0)
    # Dropout(0.2): identity in eval mode (see TODO at top).
    h = h.astype(jnp.bfloat16)

    # fc2 collapsed to the single logit difference d = logit1 - logit0.
    d = jnp.dot(h, w2d_ref[...], preferred_element_type=jnp.float32) + b2d_ref[...]

    # 2-class log-softmax, closed form (no cross-lane reduce):
    #   log p0 = -softplus(d),  log p1 = -softplus(-d)
    t = jnp.log1p(jnp.exp(-jnp.abs(d)))          # shared, numerically stable tail
    o_ref[:, 0:1] = -(jnp.maximum(d, 0.0) + t)
    o_ref[:, 1:2] = -(jnp.maximum(-d, 0.0) + t)


def prepare_params(w1, b1, w2, b2):
    """One-time parameter prep (call once, NOT per forward): bf16 weights and
    the fused fc2 difference column / bias."""
    w1b = jnp.asarray(w1, jnp.float32).astype(jnp.bfloat16)               # [768,512]
    b1f = jnp.asarray(b1, jnp.float32).reshape(1, FC1_OUT)                # [1,512]
    w2f = jnp.asarray(w2, jnp.float32).reshape(FC1_OUT, NUM_CLASSES)
    b2f = jnp.asarray(b2, jnp.float32).reshape(NUM_CLASSES)
    w2d = (w2f[:, 1] - w2f[:, 0]).reshape(FC1_OUT, 1).astype(jnp.bfloat16)  # [512,1]
    b2d = (b2f[1] - b2f[0]).reshape(1, 1)                                  # [1,1] f32
    return w1b, b1f, w2d, b2d


def bert_head_forward(cls_hs, w1b, b1f, w2d, b2d, *, tile_b=DEFAULT_TILE_B):
    """cls_hs: [B, 768] f32 -> log-probs [B, 2] f32 (prepared params)."""
    B = cls_hs.shape[0]
    x = jnp.asarray(cls_hs, jnp.float32)

    tb = _pick_tile(B, tile_b)
    grid = (pl.cdiv(B, tb),)   # ragged final block handled by Pallas; no pad copy

    return pl.pallas_call(
        _head_kernel,
        out_shape=jax.ShapeDtypeStruct((B, NUM_CLASSES), jnp.float32),
        grid=grid,
        in_specs=[
            # x: tiled over batch (double-buffered against fc1 compute)
            pl.BlockSpec((tb, HIDDEN), lambda i: (i, 0)),
            # weights/biases: constant index_map -> stay VMEM-resident
            pl.BlockSpec((HIDDEN, FC1_OUT), lambda i: (0, 0)),
            pl.BlockSpec((1, FC1_OUT), lambda i: (0, 0)),
            pl.BlockSpec((FC1_OUT, 1), lambda i: (0, 0)),
            pl.BlockSpec((1, 1), lambda i: (0, 0)),
        ],
        out_specs=pl.BlockSpec((tb, NUM_CLASSES), lambda i: (i, 0)),
        compiler_params=pltpu.CompilerParams(
            dimension_semantics=("parallel",),   # shard batch across TCs (v7x)
            vmem_limit_bytes=32 * 1024 * 1024,   # headroom for tile_b sweeps (v5e)
        ),
    )(x, w1b, b1f, w2d, b2d)


def init_params(key):
    """Deterministic torch-Linear-style init: U(-1/sqrt(fan_in), 1/sqrt(fan_in))."""
    k1, k2, k3, k4 = jax.random.split(key, 4)
    bound1 = 1.0 / jnp.sqrt(HIDDEN)
    bound2 = 1.0 / jnp.sqrt(FC1_OUT)
    w1 = jax.random.uniform(k1, (HIDDEN, FC1_OUT), jnp.float32, -bound1, bound1)
    b1 = jax.random.uniform(k2, (1, FC1_OUT), jnp.float32, -bound1, bound1)
    w2 = jax.random.uniform(k3, (FC1_OUT, NUM_CLASSES), jnp.float32, -bound2, bound2)
    b2 = jax.random.uniform(k4, (1, NUM_CLASSES), jnp.float32, -bound2, bound2)
    return w1, b1, w2, b2


def reference_forward(cls_hs, w1, b1, w2, b2):
    """Pure-JAX reference mirroring the kernel's bf16 operand quantization,
    with jax.nn.log_softmax as the independent check of the softplus form."""
    xq = cls_hs.astype(jnp.bfloat16).astype(jnp.float32)
    w1q = w1.astype(jnp.bfloat16).astype(jnp.float32)
    h = jnp.maximum(
        jnp.dot(xq, w1q, precision=jax.lax.Precision.HIGHEST) + b1.reshape(1, -1),
        0.0)
    hq = h.astype(jnp.bfloat16).astype(jnp.float32)
    w2f = w2.reshape(FC1_OUT, NUM_CLASSES)
    b2f = b2.reshape(NUM_CLASSES)
    w2dq = (w2f[:, 1] - w2f[:, 0]).astype(jnp.bfloat16).astype(jnp.float32)
    d = (jnp.dot(hq, w2dq.reshape(FC1_OUT, 1), precision=jax.lax.Precision.HIGHEST)
         + (b2f[1] - b2f[0]))
    logits = jnp.concatenate([jnp.zeros_like(d), d], axis=1)  # shift-invariant
    return jax.nn.log_softmax(logits, axis=1)


if __name__ == "__main__":
    key = jax.random.PRNGKey(0)
    k_x, k_p = jax.random.split(key)

    B = 8
    # Stand-in for the pooled [CLS] hidden state produced by `bert`.
    cls_hs = jax.random.normal(k_x, (B, HIDDEN), jnp.float32)
    w1, b1, w2, b2 = init_params(k_p)

    # Params are prepared ONCE (bf16 cast + fc2 diff), outside the forward path.
    prepared = prepare_params(w1, b1, w2, b2)

    out = bert_head_forward(cls_hs, *prepared)
    out = jax.block_until_ready(out)

    ref = reference_forward(cls_hs, w1, b1, w2, b2)
    assert out.shape == (B, NUM_CLASSES), out.shape
    assert bool(jnp.all(jnp.isfinite(out))), "non-finite log-probs"
    max_err = float(jnp.max(jnp.abs(out - ref)))
    assert jnp.allclose(out, ref, atol=2e-3, rtol=2e-3), max_err
    print("KERNEL_OK")
</pallas_src>

<mosaic_0001>
module attributes {stable_mosaic.version = 11 : i64} {
  func.func @_head_kernel(%arg0: i32, %arg1: memref<8x768xf32, #tpu.memory_space<vmem>>, %arg2: memref<768x512xbf16, #tpu.memory_space<vmem>>, %arg3: memref<1x512xf32, #tpu.memory_space<vmem>>, %arg4: memref<512x1xbf16, #tpu.memory_space<vmem>>, %arg5: memref<1x1xf32, #tpu.memory_space<vmem>>, %arg6: memref<8x2xf32, #tpu.memory_space<vmem>>) attributes {dimension_semantics = [#tpu.dimension_semantics<parallel>], iteration_bounds = array<i64: 1>, scalar_prefetch = 0 : i64, scratch_operands = 0 : i64, tpu.core_type = #tpu.core_type<tc>, window_params = [{transform_indices = @transform_0, window_bounds = array<i64: 8, 768>}, {pipeline_mode = #tpu.pipeline_mode<synchronous>, transform_indices = @transform_1, window_bounds = array<i64: 768, 512>}, {pipeline_mode = #tpu.pipeline_mode<synchronous>, transform_indices = @transform_2, window_bounds = array<i64: 1, 512>}, {pipeline_mode = #tpu.pipeline_mode<synchronous>, transform_indices = @transform_3, window_bounds = array<i64: 512, 1>}, {pipeline_mode = #tpu.pipeline_mode<synchronous>, transform_indices = @transform_4, window_bounds = array<i64: 1, 1>}, {transform_indices = @transform_5, window_bounds = array<i64: 8, 2>}]} {
    %c0 = arith.constant 0 : index
    %c0_0 = arith.constant 0 : index
    %0 = vector.load %arg1[%c0, %c0_0] : memref<8x768xf32, #tpu.memory_space<vmem>>, vector<8x768xf32>
    %1 = arith.truncf %0 : vector<8x768xf32> to vector<8x768xbf16>
    %c0_1 = arith.constant 0 : index
    %c0_2 = arith.constant 0 : index
    %2 = vector.load %arg2[%c0_1, %c0_2] : memref<768x512xbf16, #tpu.memory_space<vmem>>, vector<768x512xbf16>
    %cst = arith.constant dense<0.000000e+00> : vector<8x512xf32>
    %3 = tpu.matmul %1, %2, %cst {dimension_numbers = #tpu.dot_dimension_numbers<[1], [0], [0], [1], [0, 0, 1, 1], [], []>} : vector<8x768xbf16>, vector<768x512xbf16>, vector<8x512xf32> -> vector<8x512xf32>
    %c0_3 = arith.constant 0 : index
    %c0_4 = arith.constant 0 : index
    %4 = vector.load %arg3[%c0_3, %c0_4] : memref<1x512xf32, #tpu.memory_space<vmem>>, vector<1x512xf32>
    %5 = vector.broadcast %4 : vector<1x512xf32> to vector<8x512xf32>
    %6 = arith.addf %3, %5 : vector<8x512xf32>
    %cst_5 = arith.constant 0.000000e+00 : f32
    %7 = vector.broadcast %cst_5 : f32 to vector<8x512xf32>
    %8 = arith.maximumf %6, %7 : vector<8x512xf32>
    %9 = arith.truncf %8 : vector<8x512xf32> to vector<8x512xbf16>
    %c0_6 = arith.constant 0 : index
    %c0_7 = arith.constant 0 : index
    %10 = vector.load %arg4[%c0_6, %c0_7] : memref<512x1xbf16, #tpu.memory_space<vmem>>, vector<512x1xbf16>
    %cst_8 = arith.constant dense<0.000000e+00> : vector<8x1xf32>
    %11 = tpu.matmul %9, %10, %cst_8 {dimension_numbers = #tpu.dot_dimension_numbers<[1], [0], [0], [1], [0, 0, 1, 1], [], []>} : vector<8x512xbf16>, vector<512x1xbf16>, vector<8x1xf32> -> vector<8x1xf32>
    %c0_9 = arith.constant 0 : index
    %c0_10 = arith.constant 0 : index
    %12 = vector.load %arg5[%c0_9, %c0_10] : memref<1x1xf32, #tpu.memory_space<vmem>>, vector<1x1xf32>
    %13 = vector.broadcast %12 : vector<1x1xf32> to vector<8x1xf32>
    %14 = arith.addf %11, %13 : vector<8x1xf32>
    %15 = math.absf %14 : vector<8x1xf32>
    %cst_11 = arith.constant 0.000000e+00 : f32
    %16 = vector.broadcast %cst_11 : f32 to vector<8x1xf32>
    %17 = arith.subf %16, %15 : vector<8x1xf32>
    %18 = math.exp %17 : vector<8x1xf32>
    %19 = math.log1p %18 : vector<8x1xf32>
    %cst_12 = arith.constant 0.000000e+00 : f32
    %20 = vector.broadcast %cst_12 : f32 to vector<8x1xf32>
    %21 = arith.maximumf %14, %20 : vector<8x1xf32>
    %22 = arith.addf %21, %19 : vector<8x1xf32>
    %cst_13 = arith.constant 0.000000e+00 : f32
    %23 = vector.broadcast %cst_13 : f32 to vector<8x1xf32>
    %24 = arith.subf %23, %22 : vector<8x1xf32>
    %c0_14 = arith.constant 0 : index
    %c0_15 = arith.constant 0 : index
    %25 = vector.load %arg6[%c0_14, %c0_15] : memref<8x2xf32, #tpu.memory_space<vmem>>, vector<8x1xf32>
    tpu.vector_store %arg6[%c0_14, %c0_15], %24 {strides = array<i32>} : memref<8x2xf32, #tpu.memory_space<vmem>>, vector<8x1xf32>,
    %cst_16 = arith.constant 0.000000e+00 : f32
    %26 = vector.broadcast %cst_16 : f32 to vector<8x1xf32>
    %27 = arith.subf %26, %14 : vector<8x1xf32>
    %cst_17 = arith.constant 0.000000e+00 : f32
    %28 = vector.broadcast %cst_17 : f32 to vector<8x1xf32>
    %29 = arith.maximumf %27, %28 : vector<8x1xf32>
    %30 = arith.addf %29, %19 : vector<8x1xf32>
    %cst_18 = arith.constant 0.000000e+00 : f32
    %31 = vector.broadcast %cst_18 : f32 to vector<8x1xf32>
    %32 = arith.subf %31, %30 : vector<8x1xf32>
    %c0_19 = arith.constant 0 : index
    %c1 = arith.constant 1 : index
    %33 = vector.load %arg6[%c0_19, %c1] : memref<8x2xf32, #tpu.memory_space<vmem>>, vector<8x1xf32>
    tpu.vector_store %arg6[%c0_19, %c1], %32 {strides = array<i32>} : memref<8x2xf32, #tpu.memory_space<vmem>>, vector<8x1xf32>,
    return
  }
  func.func @transform_0(%arg0: i32) -> (i32, i32) {
    %c0_i32 = arith.constant 0 : i32
    %c0_i32_0 = arith.constant 0 : i32
    return %arg0, %c0_i32 : i32, i32
  }
  func.func @transform_1(%arg0: i32) -> (i32, i32) {
    %c0_i32 = arith.constant 0 : i32
    %c0_i32_0 = arith.constant 0 : i32
    %c0_i32_1 = arith.constant 0 : i32
    return %c0_i32, %c0_i32_0 : i32, i32
  }
  func.func @transform_2(%arg0: i32) -> (i32, i32) {
    %c0_i32 = arith.constant 0 : i32
    %c0_i32_0 = arith.constant 0 : i32
    %c0_i32_1 = arith.constant 0 : i32
    return %c0_i32, %c0_i32_0 : i32, i32
  }
  func.func @transform_3(%arg0: i32) -> (i32, i32) {
    %c0_i32 = arith.constant 0 : i32
    %c0_i32_0 = arith.constant 0 : i32
    %c0_i32_1 = arith.constant 0 : i32
    return %c0_i32, %c0_i32_0 : i32, i32
  }
  func.func @transform_4(%arg0: i32) -> (i32, i32) {
    %c0_i32 = arith.constant 0 : i32
    %c0_i32_0 = arith.constant 0 : i32
    %c0_i32_1 = arith.constant 0 : i32
    return %c0_i32, %c0_i32_0 : i32, i32
  }
  func.func @transform_5(%arg0: i32) -> (i32, i32) {
    %c0_i32 = arith.constant 0 : i32
    %c0_i32_0 = arith.constant 0 : i32
    return %arg0, %c0_i32 : i32, i32
  }
}

</mosaic_0001>

<bundles_post_ra>
// kernel: tpu_custom_call.1
= control target key start
LH: loop header
LB: loop body
LE: loop exit
PB: predicated region body
PF: predicated region fallthrough
CT: control target
= control target key end

     0   :  { %s2659_s0 = inlined_call_operand.vmem [shape: f32[8,768], index: 0, kind: input, shape index: {}]   ;;  %s2660_s1 = inlined_call_operand.hbm [shape: bf16[768,512], index: 1, kind: input, shape index: {}]   ;;  %s2661_s2 = inlined_call_operand.vmem [shape: f32[1,512], index: 2, kind: input, shape index: {}]   ;;  %s2662_s3 = inlined_call_operand.vmem [shape: bf16[512,1], index: 3, kind: input, shape index: {}]   ;;  %s2663_s4 = inlined_call_operand.<no memory space> [shape: f32[1,1], index: 4, kind: input, shape index: {}]   ;;  %s2664_s5 = inlined_call_operand.vmem [shape: f32[8,2], index: 5, kind: output, shape index: {}]  }
   0x1   :  { %v10_v0 = vstv %s2663_s4 }
   0x2   :  { %11 = vst [vmem:[#allocation2] sm:$0x1] %v10_v0 }
   0x3   :  { %12 = vsyncpa [#allocation4], 0  ;;  %s2472_s20 = smov [#allocation3]  }
   0x4   :  { %s20_s21 = sshll.u32 %s2472_s20, 4  ;;  %s21_s21 = int_to_ptr.vmem [resolvable:$true] %s20_s21 }
   0x5   :  { %s2458_s22 = scalar_lea.vmem %s21_s21, 24576  ;;  %p2463_p1 = scmp.lt.s32.totalorder %s21_s21, %s21_s21 }
   0x6   :  { %p2459_p0 = scmp.ne.s32.totalorder %s21_s21, %s2458_s22  ;;  %p2464_p2 = scmp.lt.s32.totalorder %s2458_s22, %s2458_s22 }
   0x8   :  { %p2465_p3 = por %p2464_p2, %p2463_p1 }
   0xa   :  { %p2466_p4 = pnand %p2465_p3, %p2459_p0 }
   0xc   :  { %2469 = shalt.err (!%p2466_p4)
}
   0xd   :  { %s2473_s23 = smov 256   ;;  %s2474_s24 = smov 16  }
   0xe   :  { %26 = dma.hbm_to_vmem [thread:$0]  %s2660_s1, 24576, %s21_s21, [#allocation4], %s2473_s23, %s2473_s23, %s2474_s24  }
   0xf   :  { %2470 = dma.done.wait [#allocation4], 24576  }
  0x10   :  { %2471 = vsyncadd [#allocation4], 4294942720  ;;  %v2126_v1 = vld [vmem:[#allocation3 + $0xe4] ss:$16 sps:$4 sm:$0xff]   ;;  %v2130_v3 = vld [vmem:[#allocation3 + $0xe0] ss:$16 sps:$4 sm:$0xff]  }
  0x11   :  { %v2128_v2 = vld [vmem:[#allocation3 + $0x2e4] ss:$16 sps:$4 sm:$0xff]   ;;  %1223 = vmatprep.subr.bf16.mxu0 %v2126_v1  ;;  %v2131_v4 = vld [vmem:[#allocation3 + $0x2e0] ss:$16 sps:$4 sm:$0xff]   ;;  %vm1836_vm1 = vcmask 7168   ;;  %vm1846_vm2 = vcmask 15368  }
  0x12   :  { %1264 = vmatprep.subr.bf16.mxu1 %v2128_v2  ;;  %v2132_v5 = vld [vmem:[#allocation3 + $0xc4] ss:$16 sps:$4 sm:$0xff]   ;;  %1224 = vmatpush1.bf16.msra.mxu0 %v2130_v3  ;;  %v2136_v7 = vld [vmem:[#allocation3 + $0xc0] ss:$16 sps:$4 sm:$0xff]  }
  0x13   :  { %1265 = vmatpush1.bf16.msra.mxu1 %v2131_v4  ;;  %v2134_v6 = vld [vmem:[#allocation3 + $0x2c4] ss:$16 sps:$4 sm:$0xff]   ;;  %1225 = vmatprep.subr.bf16.mxu0 %v2132_v5  ;;  %v2137_v8 = vld [vmem:[#allocation3 + $0x2c0] ss:$16 sps:$4 sm:$0xff]  }
  0x14   :  { %1266 = vmatprep.subr.bf16.mxu1 %v2134_v6  ;;  %v2138_v9 = vld [vmem:[#allocation3 + $0xa4] ss:$16 sps:$4 sm:$0xff]   ;;  %v2142_v11 = vld [vmem:[#allocation3 + $0xa0] ss:$16 sps:$4 sm:$0xff]  }
  0x15   :  { %v2140_v10 = vld [vmem:[#allocation3 + $0x2a4] ss:$16 sps:$4 sm:$0xff]   ;;  %v2143_v12 = vld [vmem:[#allocation3 + $0x2a0] ss:$16 sps:$4 sm:$0xff]  }
  0x16   :  { %1226 = vmatpush1.bf16.msra.mxu0 %v2136_v7  ;;  %v2144_v13 = vld [vmem:[#allocation3 + $0x84] ss:$16 sps:$4 sm:$0xff]   ;;  %v2148_v15 = vld [vmem:[#allocation3 + $0x80] ss:$16 sps:$4 sm:$0xff]  }
  0x17   :  { %1267 = vmatpush1.bf16.msra.mxu1 %v2137_v8  ;;  %1227 = vmatprep.subr.bf16.mxu0 %v2138_v9  ;;  %v2146_v14 = vld [vmem:[#allocation3 + $0x284] ss:$16 sps:$4 sm:$0xff]   ;;  %v2149_v16 = vld [vmem:[#allocation3 + $0x280] ss:$16 sps:$4 sm:$0xff]   ;;  %v2227_v8 = vld [vmem:[#allocation3 + $0xec] ss:$16 sps:$4 sm:$0xff]  }
  0x18   :  { %1268 = vmatprep.subr.bf16.mxu1 %v2140_v10  ;;  %v2150_v17 = vld [vmem:[#allocation3 + $0x64] ss:$16 sps:$4 sm:$0xff]   ;;  %v2154_v19 = vld [vmem:[#allocation3 + $0x60] ss:$16 sps:$4 sm:$0xff]  }
  0x19   :  { %v2152_v18 = vld [vmem:[#allocation3 + $0x264] ss:$16 sps:$4 sm:$0xff]   ;;  %v2155_v20 = vld [vmem:[#allocation3 + $0x260] ss:$16 sps:$4 sm:$0xff]  }
  0x1a   :  { %1228 = vmatpush1.bf16.msra.mxu0 %v2142_v11  ;;  %v2156_v21 = vld [vmem:[#allocation3 + $0x44] ss:$16 sps:$4 sm:$0xff]   ;;  %v2160_v23 = vld [vmem:[#allocation3 + $0x40] ss:$16 sps:$4 sm:$0xff]  }
  0x1b   :  { %1269 = vmatpush1.bf16.msra.mxu1 %v2143_v12  ;;  %1229 = vmatprep.subr.bf16.mxu0 %v2144_v13  ;;  %v2158_v22 = vld [vmem:[#allocation3 + $0x244] ss:$16 sps:$4 sm:$0xff]   ;;  %v2161_v24 = vld [vmem:[#allocation3 + $0x240] ss:$16 sps:$4 sm:$0xff]   ;;  %v2225_v12 = vld [vmem:[#allocation3 + $0xe8] ss:$16 sps:$4 sm:$0xff]  }
  0x1c   :  { %1270 = vmatprep.subr.bf16.mxu1 %v2146_v14  ;;  %v2162_v25 = vld [vmem:[#allocation3 + $0x24] ss:$16 sps:$4 sm:$0xff]   ;;  %v2166_v27 = vld [vmem:[#allocation3 + $0x20] ss:$16 sps:$4 sm:$0xff]   ;;  %v2233_v14 = vld [vmem:[#allocation3 + $0xcc] ss:$16 sps:$4 sm:$0xff]  }
  0x1d   :  { %v2164_v26 = vld [vmem:[#allocation3 + $0x224] ss:$16 sps:$4 sm:$0xff]   ;;  %v2167_v28 = vld [vmem:[#allocation3 + $0x220] ss:$16 sps:$4 sm:$0xff]  }
  0x1e   :  { %1230 = vmatpush1.bf16.msra.mxu0 %v2148_v15  ;;  %v2168_v29 = vld [vmem:[#allocation3 + $0x4] ss:$16 sps:$4 sm:$0xff]   ;;  %v2172_v31 = vld [vmem:[#allocation3] ss:$16 sps:$4 sm:$0xff]  }
  0x1f   :  { %1271 = vmatpush1.bf16.msra.mxu1 %v2149_v16  ;;  %1231 = vmatprep.subr.bf16.mxu0 %v2150_v17  ;;  %v2170_v30 = vld [vmem:[#allocation3 + $0x204] ss:$16 sps:$4 sm:$0xff]   ;;  %v2173_v32 = vld [vmem:[#allocation3 + $0x200] ss:$16 sps:$4 sm:$0xff]   ;;  %v2231_v16 = vld [vmem:[#allocation3 + $0xc8] ss:$16 sps:$4 sm:$0xff]  }
  0x20   :  { %1272 = vmatprep.subr.bf16.mxu1 %v2152_v18  ;;  %v2174_v33 = vld [vmem:[#allocation3 + $0x1e4] ss:$16 sps:$4 sm:$0xff]   ;;  %v2178_v35 = vld [vmem:[#allocation3 + $0x1e0] ss:$16 sps:$4 sm:$0xff]   ;;  %v2239_v18 = vld [vmem:[#allocation3 + $0xac] ss:$16 sps:$4 sm:$0xff]  }
  0x21   :  { %v2176_v34 = vld [vmem:[#allocation3 + $0x3e4] ss:$16 sps:$4 sm:$0xff]   ;;  %v2179_v36 = vld [vmem:[#allocation3 + $0x3e0] ss:$16 sps:$4 sm:$0xff]  }
  0x22   :  { %1232 = vmatpush1.bf16.msra.mxu0 %v2154_v19  ;;  %v2180_v37 = vld [vmem:[#allocation3 + $0x1c4] ss:$16 sps:$4 sm:$0xff]   ;;  %v2184_v39 = vld [vmem:[#allocation3 + $0x1c0] ss:$16 sps:$4 sm:$0xff]  }
  0x23   :  { %1273 = vmatpush1.bf16.msra.mxu1 %v2155_v20  ;;  %1233 = vmatprep.subr.bf16.mxu0 %v2156_v21  ;;  %v2182_v38 = vld [vmem:[#allocation3 + $0x3c4] ss:$16 sps:$4 sm:$0xff]   ;;  %v2185_v40 = vld [vmem:[#allocation3 + $0x3c0] ss:$16 sps:$4 sm:$0xff]   ;;  %v2237_v20 = vld [vmem:[#allocation3 + $0xa8] ss:$16 sps:$4 sm:$0xff]  }
  0x24   :  { %1274 = vmatprep.subr.bf16.mxu1 %v2158_v22  ;;  %v2186_v41 = vld [vmem:[#allocation3 + $0x1a4] ss:$16 sps:$4 sm:$0xff]   ;;  %v2190_v43 = vld [vmem:[#allocation3 + $0x1a0] ss:$16 sps:$4 sm:$0xff]   ;;  %v2245_v22 = vld [vmem:[#allocation3 + $0x8c] ss:$16 sps:$4 sm:$0xff]  }
  0x25   :  { %v2188_v42 = vld [vmem:[#allocation3 + $0x3a4] ss:$16 sps:$4 sm:$0xff]   ;;  %v2191_v44 = vld [vmem:[#allocation3 + $0x3a0] ss:$16 sps:$4 sm:$0xff]  }
  0x26   :  { %1234 = vmatpush1.bf16.msra.mxu0 %v2160_v23  ;;  %v2192_v45 = vld [vmem:[#allocation3 + $0x184] ss:$16 sps:$4 sm:$0xff]   ;;  %v2196_v48 = vld [vmem:[#allocation3 + $0x180] ss:$16 sps:$4 sm:$0xff]  }
  0x27   :  { %1275 = vmatpush1.bf16.msra.mxu1 %v2161_v24  ;;  %1235 = vmatprep.subr.bf16.mxu0 %v2162_v25  ;;  %v2194_v46 = vld [vmem:[#allocation3 + $0x384] ss:$16 sps:$4 sm:$0xff]   ;;  %v2197_v49 = vld [vmem:[#allocation3 + $0x380] ss:$16 sps:$4 sm:$0xff]   ;;  %v2243_v24 = vld [vmem:[#allocation3 + $0x88] ss:$16 sps:$4 sm:$0xff]  }
  0x28   :  { %1276 = vmatprep.subr.bf16.mxu1 %v2164_v26  ;;  %v38_v47 = vld [vmem:[%s2659_s0 + $0x8] sm:$0xff]  ;;  %v40_v51 = vld [vmem:[%s2659_s0 + $0x18] sm:$0xff]  ;;  %v2202_v55 = vld [vmem:[#allocation3 + $0x160] ss:$16 sps:$4 sm:$0xff]  }
  0x29   :  { %v2515_v50 = vpack.c.bf16 %v38_v47, %v38_v47  ;;  %v2198_v52 = vld [vmem:[#allocation3 + $0x164] ss:$16 sps:$4 sm:$0xff]   ;;  %v2520_v53 = vpack.c.bf16 %v40_v51, %v40_v51  ;;  %v2203_v56 = vld [vmem:[#allocation3 + $0x360] ss:$16 sps:$4 sm:$0xff]   ;;  %v2251_v26 = vld [vmem:[#allocation3 + $0x6c] ss:$16 sps:$4 sm:$0xff]  }
  0x2a   :  { %1236 = vmatpush1.bf16.msra.mxu0 %v2166_v27  ;;  %v2200_v54 = vld [vmem:[#allocation3 + $0x364] ss:$16 sps:$4 sm:$0xff]   ;;  %v2208_v59 = vld [vmem:[#allocation3 + $0x140] ss:$16 sps:$4 sm:$0xff]  }
  0x2b   :  { %1277 = vmatpush1.bf16.msra.mxu1 %v2167_v28  ;;  %1237 = vmatprep.subr.bf16.mxu0 %v2168_v29  ;;  %v2204_v57 = vld [vmem:[#allocation3 + $0x144] ss:$16 sps:$4 sm:$0xff]   ;;  %v2209_v60 = vld [vmem:[#allocation3 + $0x340] ss:$16 sps:$4 sm:$0xff]   ;;  %v2249_v28 = vld [vmem:[#allocation3 + $0x68] ss:$16 sps:$4 sm:$0xff]  }
  0x2c   :  { %1278 = vmatprep.subr.bf16.mxu1 %v2170_v30  ;;  %1255 = vmatprep.mubr.bf16.mxu0 %v2515_v50  ;;  %v2206_v58 = vld [vmem:[#allocation3 + $0x344] ss:$16 sps:$4 sm:$0xff]   ;;  %v2214_v63 = vld [vmem:[#allocation3 + $0x120] ss:$16 sps:$4 sm:$0xff]   ;;  %v2257_v30 = vld [vmem:[#allocation3 + $0x4c] ss:$16 sps:$4 sm:$0xff]  }
  0x2d   :  { %1296 = vmatprep.mubr.bf16.mxu1 %v2520_v53  ;;  %v2210_v61 = vld [vmem:[#allocation3 + $0x124] ss:$16 sps:$4 sm:$0xff]   ;;  %v2215_v0 = vld [vmem:[#allocation3 + $0x320] ss:$16 sps:$4 sm:$0xff]  }
  0x2e   :  { %1238 = vmatpush1.bf16.msra.mxu0 %v2172_v31  ;;  %v2212_v62 = vld [vmem:[#allocation3 + $0x324] ss:$16 sps:$4 sm:$0xff]   ;;  %v2220_v3 = vld [vmem:[#allocation3 + $0x100] ss:$16 sps:$4 sm:$0xff]  }
  0x2f   :  { %1279 = vmatpush1.bf16.msra.mxu1 %v2173_v32  ;;  %1239 = vmatprep.subr.bf16.mxu0 %v2174_v33  ;;  %v2216_v1 = vld [vmem:[#allocation3 + $0x104] ss:$16 sps:$4 sm:$0xff]   ;;  %v2221_v4 = vld [vmem:[#allocation3 + $0x300] ss:$16 sps:$4 sm:$0xff]   ;;  %v2255_v32 = vld [vmem:[#allocation3 + $0x48] ss:$16 sps:$4 sm:$0xff]  }
  0x30   :  { %1280 = vmatprep.subr.bf16.mxu1 %v2176_v34  ;;  %v2218_v2 = vld [vmem:[#allocation3 + $0x304] ss:$16 sps:$4 sm:$0xff]   ;;  %v2222_v11 = vld [vmem:[#allocation3 + $0x4e0] ss:$16 sps:$4 sm:$0xff]   ;;  %v2263_v34 = vld [vmem:[#allocation3 + $0x2c] ss:$16 sps:$4 sm:$0xff]  }
  0x31   :  { %v37_v5 = vld [vmem:[%s2659_s0] sm:$0xff]  ;;  %v39_v6 = vld [vmem:[%s2659_s0 + $0x10] sm:$0xff] }
  0x32   :  { %1240 = vmatpush2.bf16.msra.mxu0 %v2178_v35  ;;  %v2224_v7 = vld [vmem:[#allocation3 + $0x4e4] ss:$16 sps:$4 sm:$0xff]   ;;  %v2530_v9 = vpack.c.bf16 %v37_v5, %v37_v5  ;;  %v2532_v10 = vpack.c.bf16 %v39_v6, %v39_v6  ;;  %v2228_v15 = vld [vmem:[#allocation3 + $0x4c0] ss:$16 sps:$4 sm:$0xff]   ;;  %v2311_v5 = vld [vmem:[#allocation3 + $0x12c] ss:$16 sps:$4 sm:$0xff]  }
  0x33   :  { %1281 = vmatpush2.bf16.msra.mxu1 %v2179_v36  ;;  %1241 = vmatprep.subr.bf16.mxu0 %v2180_v37  ;;  %v2230_v13 = vld [vmem:[#allocation3 + $0x4c4] ss:$16 sps:$4 sm:$0xff]   ;;  %v2234_v19 = vld [vmem:[#allocation3 + $0x4a0] ss:$16 sps:$4 sm:$0xff]  }
  0x34   :  { %1282 = vmatprep.subr.bf16.mxu1 %v2182_v38  ;;  %v2236_v17 = vld [vmem:[#allocation3 + $0x4a4] ss:$16 sps:$4 sm:$0xff]   ;;  %v2240_v23 = vld [vmem:[#allocation3 + $0x480] ss:$16 sps:$4 sm:$0xff]   ;;  %v2261_v38 = vld [vmem:[#allocation3 + $0x28] ss:$16 sps:$4 sm:$0xff]  }
  0x35   :  { %v2242_v21 = vld [vmem:[#allocation3 + $0x484] ss:$16 sps:$4 sm:$0xff]   ;;  %v2246_v27 = vld [vmem:[#allocation3 + $0x460] ss:$16 sps:$4 sm:$0xff]  }
  0x36   :  { %1242 = vmatpush2.bf16.msra.mxu0 %v2184_v39  ;;  %v2248_v25 = vld [vmem:[#allocation3 + $0x464] ss:$16 sps:$4 sm:$0xff]   ;;  %v2252_v31 = vld [vmem:[#allocation3 + $0x440] ss:$16 sps:$4 sm:$0xff]  }
  0x37   :  { %1283 = vmatpush2.bf16.msra.mxu1 %v2185_v40  ;;  %1243 = vmatprep.subr.bf16.mxu0 %v2186_v41  ;;  %v2254_v29 = vld [vmem:[#allocation3 + $0x444] ss:$16 sps:$4 sm:$0xff]   ;;  %v2258_v37 = vld [vmem:[#allocation3 + $0x420] ss:$16 sps:$4 sm:$0xff]   ;;  %v2269_v40 = vld [vmem:[#allocation3 + $0xc] ss:$16 sps:$4 sm:$0xff]  }
  0x38   :  { %1284 = vmatprep.subr.bf16.mxu1 %v2188_v42  ;;  %v2260_v33 = vld [vmem:[#allocation3 + $0x424] ss:$16 sps:$4 sm:$0xff]   ;;  %v2264_v41 = vld [vmem:[#allocation3 + $0x400] ss:$16 sps:$4 sm:$0xff]   ;;  %v2267_v42 = vld [vmem:[#allocation3 + $0x8] ss:$16 sps:$4 sm:$0xff]  }
  0x39   :  { %v42_v35 = vld [vmem:[%s2659_s0 + $0x28] sm:$0xff]  ;;  %v2306_v6 = vld [vmem:[#allocation3 + $0x520] ss:$16 sps:$4 sm:$0xff]  }
  0x3a   :  { %1244 = vmatpush2.bf16.msra.mxu0 %v2190_v43  ;;  %v2540_v36 = vpack.c.bf16 %v42_v35, %v42_v35  ;;  %v2266_v39 = vld [vmem:[#allocation3 + $0x404] ss:$16 sps:$4 sm:$0xff]   ;;  %v2350_v35 = vld [vmem:[#allocation3 + $0x24c] ss:$16 sps:$4 sm:$0xff]  }
  0x3b   :  { %1285 = vmatpush2.bf16.msra.mxu1 %v2191_v44  ;;  %1245 = vmatprep.subr.bf16.mxu0 %v2192_v45  ;;  %v2272_v43 = vld [vmem:[#allocation3 + $0x5e4] ss:$16 sps:$4 sm:$0xff]   ;;  %v2275_v44 = vld [vmem:[#allocation3 + $0x1ec] ss:$16 sps:$4 sm:$0xff]   ;;  %v2270_v45 = vld [vmem:[#allocation3 + $0x5e0] ss:$16 sps:$4 sm:$0xff]  }
  0x3c   :  { %1286 = vmatprep.subr.bf16.mxu1 %v2194_v46  ;;  %v2273_v46 = vld [vmem:[#allocation3 + $0x1e8] ss:$16 sps:$4 sm:$0xff]   ;;  %v2278_v47 = vld [vmem:[#allocation3 + $0x5c4] ss:$16 sps:$4 sm:$0xff]  }
  0x3d   :  { %v2284_v51 = vld [vmem:[#allocation3 + $0x5a4] ss:$16 sps:$4 sm:$0xff]  }
  0x3e   :  { %1246 = vmatpush2.bf16.msra.mxu0 %v2196_v48  ;;  %v2281_v48 = vld [vmem:[#allocation3 + $0x1cc] ss:$16 sps:$4 sm:$0xff]  }
  0x3f   :  { %1287 = vmatpush2.bf16.msra.mxu1 %v2197_v49  ;;  %1247 = vmatprep.subr.bf16.mxu0 %v2198_v52  ;;  %v2276_v49 = vld [vmem:[#allocation3 + $0x5c0] ss:$16 sps:$4 sm:$0xff]   ;;  %v2287_v52 = vld [vmem:[#allocation3 + $0x1ac] ss:$16 sps:$4 sm:$0xff]  }
  0x40   :  { %1288 = vmatprep.subr.bf16.mxu1 %v2200_v54  ;;  %v2282_v54 = vld [vmem:[#allocation3 + $0x5a0] ss:$16 sps:$4 sm:$0xff]  }
  0x42   :  { %1248 = vmatpush2.bf16.msra.mxu0 %v2202_v55  ;;  %v2285_v55 = vld [vmem:[#allocation3 + $0x1a8] ss:$16 sps:$4 sm:$0xff]  }
  0x43   :  { %1289 = vmatpush2.bf16.msra.mxu1 %v2203_v56  ;;  %1249 = vmatprep.subr.bf16.mxu0 %v2204_v57  ;;  %v2290_v56 = vld [vmem:[#allocation3 + $0x584] ss:$16 sps:$4 sm:$0xff]   ;;  %v2293_v57 = vld [vmem:[#allocation3 + $0x18c] ss:$16 sps:$4 sm:$0xff]  }
  0x44   :  { %1290 = vmatprep.subr.bf16.mxu1 %v2206_v58  ;;  %v2288_v58 = vld [vmem:[#allocation3 + $0x580] ss:$16 sps:$4 sm:$0xff]  }
  0x46   :  { %1250 = vmatpush2.bf16.msra.mxu0 %v2208_v59  ;;  %v2291_v59 = vld [vmem:[#allocation3 + $0x188] ss:$16 sps:$4 sm:$0xff]  }
  0x47   :  { %1291 = vmatpush2.bf16.msra.mxu1 %v2209_v60  ;;  %1251 = vmatprep.subr.bf16.mxu0 %v2210_v61  ;;  %v2296_v60 = vld [vmem:[#allocation3 + $0x564] ss:$16 sps:$4 sm:$0xff]   ;;  %v2299_v61 = vld [vmem:[#allocation3 + $0x16c] ss:$16 sps:$4 sm:$0xff]  }
  0x48   :  { %1292 = vmatprep.subr.bf16.mxu1 %v2212_v62  ;;  %v2294_v62 = vld [vmem:[#allocation3 + $0x560] ss:$16 sps:$4 sm:$0xff]  }
  0x4a   :  { %1252 = vmatpush2.bf16.msra.mxu0 %v2214_v63  ;;  %v2297_v63 = vld [vmem:[#allocation3 + $0x168] ss:$16 sps:$4 sm:$0xff]  }
  0x4b   :  { %1293 = vmatpush2.bf16.msra.mxu1 %v2215_v0  ;;  %1253 = vmatprep.subr.bf16.mxu0 %v2216_v1  ;;  %v2302_v0 = vld [vmem:[#allocation3 + $0x544] ss:$16 sps:$4 sm:$0xff]   ;;  %v2305_v1 = vld [vmem:[#allocation3 + $0x14c] ss:$16 sps:$4 sm:$0xff]  }
  0x4c   :  { %1294 = vmatprep.subr.bf16.mxu1 %v2218_v2  ;;  %v2300_v2 = vld [vmem:[#allocation3 + $0x540] ss:$16 sps:$4 sm:$0xff]  }
  0x4e   :  { %1254 = vmatpush2.bf16.msra.mxu0 %v2220_v3  ;;  %v2303_v3 = vld [vmem:[#allocation3 + $0x148] ss:$16 sps:$4 sm:$0xff]  }
  0x4f   :  { %1295 = vmatpush2.bf16.msra.mxu1 %v2221_v4  ;;  %1305 = vmatprep.subr.bf16.mxu0 %v2224_v7  ;;  %v2308_v4 = vld [vmem:[#allocation3 + $0x524] ss:$16 sps:$4 sm:$0xff]   ;;  %v2309_v7 = vld [vmem:[#allocation3 + $0x128] ss:$16 sps:$4 sm:$0xff]  }
  0x50   :  { %1346 = vmatprep.subr.bf16.mxu1 %v2227_v8  ;;  %v2314_v8 = vld [vmem:[#allocation3 + $0x504] ss:$16 sps:$4 sm:$0xff]  }
  0x51   :  { %1256 = vmatmul.mubr.bf16.vlgmr.msra.gmra.mxu0 %v2530_v9 }
  0x52   :  { %1297 = vmatmul.mubr.bf16.vlgmr.msra.gmra.mxu1 %v2532_v10  ;;  %1306 = vmatpush1.bf16.msra.mxu0 %v2222_v11  ;;  %v2317_v11 = vld [vmem:[#allocation3 + $0x10c] ss:$16 sps:$4 sm:$0xff]  }
  0x53   :  { %1347 = vmatpush1.bf16.msra.mxu1 %v2225_v12  ;;  %1307 = vmatprep.subr.bf16.mxu0 %v2230_v13  ;;  %v2312_v12 = vld [vmem:[#allocation3 + $0x500] ss:$16 sps:$4 sm:$0xff]   ;;  %v2315_v13 = vld [vmem:[#allocation3 + $0x108] ss:$16 sps:$4 sm:$0xff]  }
  0x54   :  { %1348 = vmatprep.subr.bf16.mxu1 %v2233_v14  ;;  %1378 = vmatprep.mubr.bf16.mxu1 %v2515_v50  ;;  %v2279_v50 = vld [vmem:[#allocation3 + $0x1c8] ss:$16 sps:$4 sm:$0xff]   ;;  %v41_v14 = vld [vmem:[%s2659_s0 + $0x20] sm:$0xff] }
  0x55   :  { %1337 = vmatprep.mubr.bf16.mxu0 %v2540_v36 }
  0x56   :  { %1308 = vmatpush1.bf16.msra.mxu0 %v2228_v15  ;;  %v2320_v15 = vld [vmem:[#allocation3 + $0x2ec] ss:$16 sps:$4 sm:$0xff]  }
  0x57   :  { %1349 = vmatpush1.bf16.msra.mxu1 %v2231_v16  ;;  %1309 = vmatprep.subr.bf16.mxu0 %v2236_v17  ;;  %v2323_v16 = vld [vmem:[#allocation3 + $0x4ec] ss:$16 sps:$4 sm:$0xff]   ;;  %v2546_v17 = vpack.c.bf16 %v41_v14, %v41_v14 }
  0x58   :  { %1350 = vmatprep.subr.bf16.mxu1 %v2239_v18  ;;  %v2318_v18 = vld [vmem:[#allocation3 + $0x2e8] ss:$16 sps:$4 sm:$0xff]   ;;  %v2413_v14 = vld [vmem:[#allocation3 + $0x50c] ss:$16 sps:$4 sm:$0xff]  }
  0x5a   :  { %1310 = vmatpush1.bf16.msra.mxu0 %v2234_v19  ;;  %v2321_v19 = vld [vmem:[#allocation3 + $0x4e8] ss:$16 sps:$4 sm:$0xff]  }
  0x5b   :  { %1351 = vmatpush1.bf16.msra.mxu1 %v2237_v20  ;;  %1311 = vmatprep.subr.bf16.mxu0 %v2242_v21  ;;  %v2326_v20 = vld [vmem:[#allocation3 + $0x2cc] ss:$16 sps:$4 sm:$0xff]  }
  0x5c   :  { %1352 = vmatprep.subr.bf16.mxu1 %v2245_v22  ;;  %v2329_v21 = vld [vmem:[#allocation3 + $0x4cc] ss:$16 sps:$4 sm:$0xff]   ;;  %v2324_v22 = vld [vmem:[#allocation3 + $0x2c8] ss:$16 sps:$4 sm:$0xff]  }
  0x5e   :  { %1312 = vmatpush1.bf16.msra.mxu0 %v2240_v23  ;;  %v2327_v23 = vld [vmem:[#allocation3 + $0x4c8] ss:$16 sps:$4 sm:$0xff]  }
  0x5f   :  { %1353 = vmatpush1.bf16.msra.mxu1 %v2243_v24  ;;  %1313 = vmatprep.subr.bf16.mxu0 %v2248_v25  ;;  %v2332_v24 = vld [vmem:[#allocation3 + $0x2ac] ss:$16 sps:$4 sm:$0xff]  }
  0x60   :  { %1354 = vmatprep.subr.bf16.mxu1 %v2251_v26  ;;  %v2335_v25 = vld [vmem:[#allocation3 + $0x4ac] ss:$16 sps:$4 sm:$0xff]   ;;  %v2330_v26 = vld [vmem:[#allocation3 + $0x2a8] ss:$16 sps:$4 sm:$0xff]  }
  0x62   :  { %1314 = vmatpush1.bf16.msra.mxu0 %v2246_v27  ;;  %v2333_v27 = vld [vmem:[#allocation3 + $0x4a8] ss:$16 sps:$4 sm:$0xff]  }
  0x63   :  { %1355 = vmatpush1.bf16.msra.mxu1 %v2249_v28  ;;  %1315 = vmatprep.subr.bf16.mxu0 %v2254_v29  ;;  %v2338_v28 = vld [vmem:[#allocation3 + $0x28c] ss:$16 sps:$4 sm:$0xff]  }
  0x64   :  { %1356 = vmatprep.subr.bf16.mxu1 %v2257_v30  ;;  %v2341_v29 = vld [vmem:[#allocation3 + $0x48c] ss:$16 sps:$4 sm:$0xff]   ;;  %v2336_v30 = vld [vmem:[#allocation3 + $0x288] ss:$16 sps:$4 sm:$0xff]  }
  0x66   :  { %1316 = vmatpush1.bf16.msra.mxu0 %v2252_v31  ;;  %v2344_v31 = vld [vmem:[#allocation3 + $0x26c] ss:$16 sps:$4 sm:$0xff]  }
  0x67   :  { %1357 = vmatpush1.bf16.msra.mxu1 %v2255_v32  ;;  %1317 = vmatprep.subr.bf16.mxu0 %v2260_v33  ;;  %v2347_v32 = vld [vmem:[#allocation3 + $0x46c] ss:$16 sps:$4 sm:$0xff]   ;;  %v2342_v33 = vld [vmem:[#allocation3 + $0x268] ss:$16 sps:$4 sm:$0xff]  }
  0x68   :  { %1358 = vmatprep.subr.bf16.mxu1 %v2263_v34  ;;  %v2345_v34 = vld [vmem:[#allocation3 + $0x468] ss:$16 sps:$4 sm:$0xff]  }
  0x6a   :  { %1318 = vmatpush1.bf16.msra.mxu0 %v2258_v37  ;;  %v2351_v37 = vld [vmem:[#allocation3 + $0x448] ss:$16 sps:$4 sm:$0xff]  }
  0x6b   :  { %1359 = vmatpush1.bf16.msra.mxu1 %v2261_v38  ;;  %1319 = vmatprep.subr.bf16.mxu0 %v2266_v39  ;;  %v2356_v38 = vld [vmem:[#allocation3 + $0x22c] ss:$16 sps:$4 sm:$0xff]  }
  0x6c   :  { %1360 = vmatprep.subr.bf16.mxu1 %v2269_v40  ;;  %v2359_v39 = vld [vmem:[#allocation3 + $0x42c] ss:$16 sps:$4 sm:$0xff]   ;;  %v2354_v40 = vld [vmem:[#allocation3 + $0x228] ss:$16 sps:$4 sm:$0xff]  }
  0x6e   :  { %1320 = vmatpush1.bf16.msra.mxu0 %v2264_v41  ;;  %v2357_v41 = vld [vmem:[#allocation3 + $0x428] ss:$16 sps:$4 sm:$0xff]  }
  0x6f   :  { %1361 = vmatpush1.bf16.msra.mxu1 %v2267_v42  ;;  %1321 = vmatprep.subr.bf16.mxu0 %v2272_v43  ;;  %v2362_v42 = vld [vmem:[#allocation3 + $0x20c] ss:$16 sps:$4 sm:$0xff]  }
  0x70   :  { %1362 = vmatprep.subr.bf16.mxu1 %v2275_v44  ;;  %v2365_v43 = vld [vmem:[#allocation3 + $0x40c] ss:$16 sps:$4 sm:$0xff]   ;;  %v2360_v44 = vld [vmem:[#allocation3 + $0x208] ss:$16 sps:$4 sm:$0xff]  }
  0x72   :  { %1322 = vmatpush2.bf16.msra.mxu0 %v2270_v45  ;;  %v2363_v45 = vld [vmem:[#allocation3 + $0x408] ss:$16 sps:$4 sm:$0xff]  }
  0x73   :  { %1363 = vmatpush2.bf16.msra.mxu1 %v2273_v46  ;;  %1323 = vmatprep.subr.bf16.mxu0 %v2278_v47  ;;  %v2368_v46 = vld [vmem:[#allocation3 + $0x3ec] ss:$16 sps:$4 sm:$0xff]  }
  0x74   :  { %1364 = vmatprep.subr.bf16.mxu1 %v2281_v48  ;;  %v2371_v47 = vld [vmem:[#allocation3 + $0x5ec] ss:$16 sps:$4 sm:$0xff]   ;;  %v2366_v48 = vld [vmem:[#allocation3 + $0x3e8] ss:$16 sps:$4 sm:$0xff]  }
  0x76   :  { %1324 = vmatpush2.bf16.msra.mxu0 %v2276_v49  ;;  %v2369_v49 = vld [vmem:[#allocation3 + $0x5e8] ss:$16 sps:$4 sm:$0xff]  }
  0x77   :  { %1365 = vmatpush2.bf16.msra.mxu1 %v2279_v50  ;;  %1325 = vmatprep.subr.bf16.mxu0 %v2284_v51  ;;  %v2374_v50 = vld [vmem:[#allocation3 + $0x3cc] ss:$16 sps:$4 sm:$0xff]  }
  0x78   :  { %1366 = vmatprep.subr.bf16.mxu1 %v2287_v52  ;;  %v2377_v51 = vld [vmem:[#allocation3 + $0x5cc] ss:$16 sps:$4 sm:$0xff]   ;;  %v2372_v52 = vld [vmem:[#allocation3 + $0x3c8] ss:$16 sps:$4 sm:$0xff]  }
  0x7a   :  { %1326 = vmatpush2.bf16.msra.mxu0 %v2282_v54  ;;  %v2375_v54 = vld [vmem:[#allocation3 + $0x5c8] ss:$16 sps:$4 sm:$0xff]  }
  0x7b   :  { %1367 = vmatpush2.bf16.msra.mxu1 %v2285_v55  ;;  %1327 = vmatprep.subr.bf16.mxu0 %v2290_v56  ;;  %v2380_v55 = vld [vmem:[#allocation3 + $0x3ac] ss:$16 sps:$4 sm:$0xff]  }
  0x7c   :  { %1368 = vmatprep.subr.bf16.mxu1 %v2293_v57  ;;  %v2383_v56 = vld [vmem:[#allocation3 + $0x5ac] ss:$16 sps:$4 sm:$0xff]   ;;  %v2378_v57 = vld [vmem:[#allocation3 + $0x3a8] ss:$16 sps:$4 sm:$0xff]  }
  0x7e   :  { %1328 = vmatpush2.bf16.msra.mxu0 %v2288_v58  ;;  %v2381_v58 = vld [vmem:[#allocation3 + $0x5a8] ss:$16 sps:$4 sm:$0xff]  }
  0x7f   :  { %1369 = vmatpush2.bf16.msra.mxu1 %v2291_v59  ;;  %1329 = vmatprep.subr.bf16.mxu0 %v2296_v60  ;;  %v2386_v59 = vld [vmem:[#allocation3 + $0x38c] ss:$16 sps:$4 sm:$0xff]  }
  0x80   :  { %1370 = vmatprep.subr.bf16.mxu1 %v2299_v61  ;;  %v2389_v60 = vld [vmem:[#allocation3 + $0x58c] ss:$16 sps:$4 sm:$0xff]   ;;  %v2384_v61 = vld [vmem:[#allocation3 + $0x388] ss:$16 sps:$4 sm:$0xff]  }
  0x82   :  { %1330 = vmatpush2.bf16.msra.mxu0 %v2294_v62  ;;  %v2387_v62 = vld [vmem:[#allocation3 + $0x588] ss:$16 sps:$4 sm:$0xff]  }
  0x83   :  { %1371 = vmatpush2.bf16.msra.mxu1 %v2297_v63  ;;  %1331 = vmatprep.subr.bf16.mxu0 %v2302_v0  ;;  %v2392_v63 = vld [vmem:[#allocation3 + $0x36c] ss:$16 sps:$4 sm:$0xff]  }
  0x84   :  { %1372 = vmatprep.subr.bf16.mxu1 %v2305_v1  ;;  %v2395_v0 = vld [vmem:[#allocation3 + $0x56c] ss:$16 sps:$4 sm:$0xff]   ;;  %v2390_v1 = vld [vmem:[#allocation3 + $0x368] ss:$16 sps:$4 sm:$0xff]  }
  0x86   :  { %1332 = vmatpush2.bf16.msra.mxu0 %v2300_v2  ;;  %v2393_v2 = vld [vmem:[#allocation3 + $0x568] ss:$16 sps:$4 sm:$0xff]  }
  0x87   :  { %1373 = vmatpush2.bf16.msra.mxu1 %v2303_v3  ;;  %1333 = vmatprep.subr.bf16.mxu0 %v2308_v4  ;;  %v2398_v3 = vld [vmem:[#allocation3 + $0x34c] ss:$16 sps:$4 sm:$0xff]  }
  0x88   :  { %1374 = vmatprep.subr.bf16.mxu1 %v2311_v5  ;;  %v2401_v4 = vld [vmem:[#allocation3 + $0x54c] ss:$16 sps:$4 sm:$0xff]   ;;  %v2396_v5 = vld [vmem:[#allocation3 + $0x348] ss:$16 sps:$4 sm:$0xff]  }
  0x8a   :  { %1334 = vmatpush2.bf16.msra.mxu0 %v2306_v6  ;;  %v2399_v6 = vld [vmem:[#allocation3 + $0x548] ss:$16 sps:$4 sm:$0xff]  }
  0x8b   :  { %1375 = vmatpush2.bf16.msra.mxu1 %v2309_v7  ;;  %1335 = vmatprep.subr.bf16.mxu0 %v2314_v8  ;;  %v2404_v7 = vld [vmem:[#allocation3 + $0x32c] ss:$16 sps:$4 sm:$0xff]  }
  0x8c   :  { %1376 = vmatprep.subr.bf16.mxu1 %v2317_v11  ;;  %v2407_v8 = vld [vmem:[#allocation3 + $0x52c] ss:$16 sps:$4 sm:$0xff]   ;;  %v2402_v11 = vld [vmem:[#allocation3 + $0x328] ss:$16 sps:$4 sm:$0xff]  }
  0x8e   :  { %1336 = vmatpush2.bf16.msra.mxu0 %v2312_v12  ;;  %v2405_v12 = vld [vmem:[#allocation3 + $0x528] ss:$16 sps:$4 sm:$0xff]  }
  0x8f   :  { %1377 = vmatpush2.bf16.msra.mxu1 %v2315_v13  ;;  %1387 = vmatprep.subr.bf16.mxu0 %v2320_v15  ;;  %v2410_v13 = vld [vmem:[#allocation3 + $0x30c] ss:$16 sps:$4 sm:$0xff]   ;;  %v2408_v15 = vld [vmem:[#allocation3 + $0x308] ss:$16 sps:$4 sm:$0xff]  }
  0x90   :  { %1428 = vmatprep.subr.bf16.mxu1 %v2323_v16  ;;  %v2411_v16 = vld [vmem:[#allocation3 + $0x508] ss:$16 sps:$4 sm:$0xff]  }
  0x91   :  { %1338 = vmatmul.mubr.bf16.vlgmr.msra.gmra.mxu0 %v2546_v17 }
  0x92   :  { %1379 = vmatmul.mubr.bf16.vlgmr.msra.gmra.mxu1 %v2530_v9  ;;  %1388 = vmatpush1.bf16.msra.mxu0 %v2318_v18  ;;  %v2339_v9 = vld [vmem:[#allocation3 + $0x488] ss:$16 sps:$4 sm:$0xff]  }
  0x93   :  { %1429 = vmatpush1.bf16.msra.mxu1 %v2321_v19  ;;  %1389 = vmatprep.subr.bf16.mxu0 %v2326_v20  ;;  %v2414_v18 = vld [vmem:[%s2662_s3 + $0x78] sm:$0xff]   ;;  %v2416_v20 = vld [vmem:[%s2662_s3 + $0x70] sm:$0xff]  }
  0x94   :  { %1430 = vmatprep.subr.bf16.mxu1 %v2329_v21  ;;  %1419 = vmatprep.mubr.bf16.mxu0 %v2520_v53  ;;  %v2353_v53 = vld [vmem:[#allocation3 + $0x44c] ss:$16 sps:$4 sm:$0xff]  }
  0x95   :  { %1460 = vmatprep.mubr.bf16.mxu1 %v2540_v36  ;;  %v2348_v36 = vld [vmem:[#allocation3 + $0x248] ss:$16 sps:$4 sm:$0xff]   ;;  %v2417_v21 = vld [vmem:[%s2662_s3 + $0x30] sm:$0xff]  }
  0x96   :  { %1390 = vmatpush1.bf16.msra.mxu0 %v2324_v22  ;;  %v2415_v19 = vld [vmem:[%s2662_s3 + $0x38] sm:$0xff]   ;;  %v2418_v22 = vld [vmem:[%s2662_s3 + $0x68] sm:$0xff]  }
  0x97   :  { %1431 = vmatpush1.bf16.msra.mxu1 %v2327_v23  ;;  %1391 = vmatprep.subr.bf16.mxu0 %v2332_v24  ;;  %v2419_v23 = vld [vmem:[%s2662_s3 + $0x28] sm:$0xff]   ;;  %v2422_v24 = vld [vmem:[%s2662_s3 + $0x58] sm:$0xff]  }
  0x98   :  { %1432 = vmatprep.subr.bf16.mxu1 %v2335_v25  ;;  %v2430_v25 = vld [vmem:[%s2662_s3 + $0xf8] sm:$0xff]  }
  0x9a   :  { %1392 = vmatpush1.bf16.msra.mxu0 %v2330_v26  ;;  %v2431_v26 = vld [vmem:[%s2662_s3 + $0xb8] sm:$0xff]  }
  0x9b   :  { %1433 = vmatpush1.bf16.msra.mxu1 %v2333_v27  ;;  %1393 = vmatprep.subr.bf16.mxu0 %v2338_v28  ;;  %v2432_v27 = vld [vmem:[%s2662_s3 + $0xf0] sm:$0xff]   ;;  %v2423_v28 = vld [vmem:[%s2662_s3 + $0x18] sm:$0xff]  }
  0x9c   :  { %1434 = vmatprep.subr.bf16.mxu1 %v2341_v29  ;;  %v2433_v29 = vld [vmem:[%s2662_s3 + $0xb0] sm:$0xff]  }
  0x9e   :  { %1394 = vmatpush1.bf16.msra.mxu0 %v2336_v30  ;;  %v2424_v30 = vld [vmem:[%s2662_s3 + $0x50] sm:$0xff]  }
  0x9f   :  { %1435 = vmatpush1.bf16.msra.mxu1 %v2339_v9  ;;  %1395 = vmatprep.subr.bf16.mxu0 %v2344_v31  ;;  %v2434_v9 = vld [vmem:[%s2662_s3 + $0xe8] sm:$0xff]   ;;  %v2425_v31 = vld [vmem:[%s2662_s3 + $0x10] sm:$0xff]  }
  0xa0   :  { %1436 = vmatprep.subr.bf16.mxu1 %v2347_v32  ;;  %v2435_v32 = vld [vmem:[%s2662_s3 + $0xa8] sm:$0xff]  }
  0xa2   :  { %1396 = vmatpush1.bf16.msra.mxu0 %v2342_v33  ;;  %v2426_v33 = vld [vmem:[%s2662_s3 + $0x48] sm:$0xff]  }
  0xa3   :  { %1437 = vmatpush1.bf16.msra.mxu1 %v2345_v34  ;;  %1397 = vmatprep.subr.bf16.mxu0 %v2350_v35  ;;  %v2436_v34 = vld [vmem:[%s2662_s3 + $0xe0] sm:$0xff]   ;;  %v2427_v35 = vld [vmem:[%s2662_s3 + $0x8] sm:$0xff]  }
  0xa4   :  { %1438 = vmatprep.subr.bf16.mxu1 %v2353_v53  ;;  %v2437_v53 = vld [vmem:[%s2662_s3 + $0xa0] sm:$0xff]  }
  0xa6   :  { %1398 = vmatpush1.bf16.msra.mxu0 %v2348_v36  ;;  %v2428_v36 = vld [vmem:[%s2662_s3 + $0x40] sm:$0xff]  }
  0xa7   :  { %1439 = vmatpush1.bf16.msra.mxu1 %v2351_v37  ;;  %1399 = vmatprep.subr.bf16.mxu0 %v2356_v38  ;;  %v2438_v37 = vld [vmem:[%s2662_s3 + $0xd8] sm:$0xff]   ;;  %v2429_v38 = vld [vmem:[%s2662_s3] sm:$0xff]  }
  0xa8   :  { %1440 = vmatprep.subr.bf16.mxu1 %v2359_v39  ;;  %v2439_v39 = vld [vmem:[%s2662_s3 + $0x98] sm:$0xff]  }
  0xaa   :  { %1400 = vmatpush1.bf16.msra.mxu0 %v2354_v40  ;;  %v2440_v40 = vld [vmem:[%s2662_s3 + $0xd0] sm:$0xff]  }
  0xab   :  { %1441 = vmatpush1.bf16.msra.mxu1 %v2357_v41  ;;  %1401 = vmatprep.subr.bf16.mxu0 %v2362_v42  ;;  %v2441_v41 = vld [vmem:[%s2662_s3 + $0x90] sm:$0xff]  }
  0xac   :  { %1442 = vmatprep.subr.bf16.mxu1 %v2365_v43 }
  0xae   :  { %1402 = vmatpush1.bf16.msra.mxu0 %v2360_v44 }
  0xaf   :  { %1443 = vmatpush1.bf16.msra.mxu1 %v2363_v45  ;;  %1403 = vmatprep.subr.bf16.mxu0 %v2368_v46  ;;  %v2442_v46 = vld [vmem:[%s2662_s3 + $0xc8] sm:$0xff]  }
  0xb0   :  { %1444 = vmatprep.subr.bf16.mxu1 %v2371_v47  ;;  %v2443_v47 = vld [vmem:[%s2662_s3 + $0x88] sm:$0xff]  }
  0xb2   :  { %1404 = vmatpush2.bf16.msra.mxu0 %v2366_v48 }
  0xb3   :  { %1445 = vmatpush2.bf16.msra.mxu1 %v2369_v49  ;;  %1405 = vmatprep.subr.bf16.mxu0 %v2374_v50 }
  0xb4   :  { %1446 = vmatprep.subr.bf16.mxu1 %v2377_v51 }
  0xb6   :  { %1406 = vmatpush2.bf16.msra.mxu0 %v2372_v52  ;;  %v2444_v52 = vld [vmem:[%s2662_s3 + $0xc0] sm:$0xff]  }
  0xb7   :  { %1447 = vmatpush2.bf16.msra.mxu1 %v2375_v54  ;;  %1407 = vmatprep.subr.bf16.mxu0 %v2380_v55  ;;  %v2445_v54 = vld [vmem:[%s2662_s3 + $0x80] sm:$0xff]   ;;  %v243_v55 = vlaneseq }
  0xb8   :  { %1448 = vmatprep.subr.bf16.mxu1 %v2383_v56 }
  0xb9   :  { %v244_v56 = vshrl.u32 %v243_v55, 7 }
  0xba   :  { %1408 = vmatpush2.bf16.msra.mxu0 %v2378_v57 }
  0xbb   :  { %1449 = vmatpush2.bf16.msra.mxu1 %v2381_v58  ;;  %1409 = vmatprep.subr.bf16.mxu0 %v2386_v59  ;;  %v245_v57 = vsub.s32 0, %v244_v56  ;;  %v241_v58 = vld [vmem:[%s2661_s2] sm:$0xf]  ;;  %v249_v59 = vsub.s32 1, %v244_v56  ;;  %s2475_s2 = smov 1  }
  0xbc   :  { %1450 = vmatprep.subr.bf16.mxu1 %v2389_v60 }
  0xbd   :  { %v246_v60 = vrot.slane %v241_v58, %v245_v57 }
  0xbe   :  { %1410 = vmatpush2.bf16.msra.mxu0 %v2384_v61  ;;  %v250_v61 = vrot.slane %v241_v58, %v249_v59 }
  0xbf   :  { %1451 = vmatpush2.bf16.msra.mxu1 %v2387_v62  ;;  %1411 = vmatprep.subr.bf16.mxu0 %v2392_v63 }
  0xc0   :  { %1452 = vmatprep.subr.bf16.mxu1 %v2395_v0 }
  0xc2   :  { %1412 = vmatpush2.bf16.msra.mxu0 %v2390_v1 }
  0xc3   :  { %1453 = vmatpush2.bf16.msra.mxu1 %v2393_v2  ;;  %1413 = vmatprep.subr.bf16.mxu0 %v2398_v3 }
  0xc4   :  { %1454 = vmatprep.subr.bf16.mxu1 %v2401_v4 }
  0xc6   :  { %1414 = vmatpush2.bf16.msra.mxu0 %v2396_v5 }
  0xc7   :  { %1455 = vmatpush2.bf16.msra.mxu1 %v2399_v6  ;;  %1415 = vmatprep.subr.bf16.mxu0 %v2404_v7 }
  0xc8   :  { %1456 = vmatprep.subr.bf16.mxu1 %v2407_v8 }
  0xca   :  { %1416 = vmatpush2.bf16.msra.mxu0 %v2402_v11 }
  0xcb   :  { %1457 = vmatpush2.bf16.msra.mxu1 %v2405_v12  ;;  %1417 = vmatprep.subr.bf16.mxu0 %v2410_v13 }
  0xcc   :  { %1458 = vmatprep.subr.bf16.mxu1 %v2413_v14 }
  0xce   :  { %1418 = vmatpush2.bf16.msra.mxu0 %v2408_v15 }
  0xcf   :  { %1459 = vmatpush2.bf16.msra.mxu1 %v2411_v16  ;;  %2078 = vmatprep.subr.bf16.mxu0 %v2414_v18 }
  0xd0   :  { %2100 = vmatprep.subr.bf16.mxu1 %v2430_v25 }
  0xd1   :  { %1420 = vmatmul.mubr.bf16.vlgmr.msra.gmra.mxu0 %v2532_v10  ;;  %v2420_v10 = vld [vmem:[%s2662_s3 + $0x60] sm:$0xff]  }
  0xd2   :  { %1461 = vmatmul.mubr.bf16.vlgmr.msra.gmra.mxu1 %v2546_v17  ;;  %2079 = vmatpush3.bf16.msra.mxu0 %v2415_v19  ;;  %v2421_v17 = vld [vmem:[%s2662_s3 + $0x20] sm:$0xff]   ;;  %v253_v19 = vsub.s32 2, %v244_v56 }
  0xd3   :  { %2080 = vmatprep.subr.bf16.mxu0 %v2416_v20  ;;  %2101 = vmatpush3.bf16.msra.mxu1 %v2431_v26  ;;  %v257_v20 = vsub.s32 3, %v244_v56 }
  0xd4   :  { %2102 = vmatprep.subr.bf16.mxu1 %v2432_v27 }
  0xd6   :  { %2081 = vmatpush3.bf16.msra.mxu0 %v2417_v21  ;;  %v254_v21 = vrot.slane %v241_v58, %v253_v19 }
  0xd7   :  { %2082 = vmatprep.subr.bf16.mxu0 %v2418_v22  ;;  %2103 = vmatpush3.bf16.msra.mxu1 %v2433_v29  ;;  %v258_v22 = vrot.slane %v241_v58, %v257_v20 }
  0xd8   :  { %2104 = vmatprep.subr.bf16.mxu1 %v2434_v9 }
  0xda   :  { %2083 = vmatpush3.bf16.msra.mxu0 %v2419_v23 }
  0xdb   :  { %2084 = vmatprep.subr.bf16.mxu0 %v2420_v10  ;;  %2105 = vmatpush3.bf16.msra.mxu1 %v2435_v32 }
  0xdc   :  { %2106 = vmatprep.subr.bf16.mxu1 %v2436_v34 }
  0xde   :  { %2085 = vmatpush3.bf16.msra.mxu0 %v2421_v17 }
  0xdf   :  { %2086 = vmatprep.subr.bf16.mxu0 %v2422_v24  ;;  %2107 = vmatpush3.bf16.msra.mxu1 %v2437_v53 }
  0xe0   :  { %2108 = vmatprep.subr.bf16.mxu1 %v2438_v37 }
  0xe2   :  { %2087 = vmatpush3.bf16.msra.mxu0 %v2423_v28 }
  0xe3   :  { %2088 = vmatprep.subr.bf16.mxu0 %v2424_v30  ;;  %2109 = vmatpush3.bf16.msra.mxu1 %v2439_v39 }
  0xe4   :  { %2110 = vmatprep.subr.bf16.mxu1 %v2440_v40 }
  0xe6   :  { %2089 = vmatpush3.bf16.msra.mxu0 %v2425_v31 }
  0xe7   :  { %2090 = vmatprep.subr.bf16.mxu0 %v2426_v33  ;;  %2111 = vmatpush3.bf16.msra.mxu1 %v2441_v41 }
  0xe8   :  { %2112 = vmatprep.subr.bf16.mxu1 %v2442_v46 }
  0xea   :  { %2091 = vmatpush3.bf16.msra.mxu0 %v2427_v35 }
  0xeb   :  { %2092 = vmatprep.subr.bf16.mxu0 %v2428_v36  ;;  %2113 = vmatpush3.bf16.msra.mxu1 %v2443_v47 }
  0xec   :  { %2114 = vmatprep.subr.bf16.mxu1 %v2444_v52 }
  0xee   :  { %2093 = vmatpush3.bf16.msra.mxu0 %v2429_v38 }
  0xef   :  { %2115 = vmatpush3.bf16.msra.mxu1 %v2445_v54 }
 0x111   :  { %v1257_v42 = vpop.f32.mrf.mxu0 }
 0x112   :  { %v1298_v43 = vpop.f32.mrf.mxu1  ;;  %v1258_v62 = vadd.f32 %v1257_v42, %v246_v60  ;;  %v2045_v42 = vld [vmem:[#allocation2] ss:$0 sm:$0xff] }
 0x113   :  { %v1259_v44 = vpop.f32.mrf.mxu0 }
 0x114   :  { %v1300_v45 = vpop.f32.mrf.mxu1  ;;  %v1260_v63 = vadd.f32 %v1259_v44, %v250_v61  ;;  %v1299_v0 = vadd.f32 %v1298_v43, %v1258_v62 }
 0x115   :  { %v1261_v48 = vpop.f32.mrf.mxu0 }
 0x116   :  { %v1302_v49 = vpop.f32.mrf.mxu1  ;;  %v1301_v3 = vadd.f32 %v1300_v45, %v1260_v63 }
 0x117   :  { %v1262_v50 = vpop.f32.mrf.mxu0 }
 0x118   :  { %v1303_v51 = vpop.f32.mrf.mxu1 }
 0x151   :  { %v1339_v1 = vpop.f32.mrf.mxu0 }
 0x152   :  { %v1380_v2 = vpop.f32.mrf.mxu1  ;;  %v1340_v4 = vadd.f32 %v1339_v1, %v1299_v0 }
 0x153   :  { %v1341_v5 = vpop.f32.mrf.mxu0  ;;  %v1381_v23 = vadd.f32 %v1380_v2, %v254_v21 }
 0x154   :  { %v1382_v6 = vpop.f32.mrf.mxu1  ;;  %v1342_v7 = vadd.f32 %v1341_v5, %v1301_v3  ;;  %v1469_v8 = vmax.f32 %v1340_v4, 0.0 }
 0x155   :  { %v1343_v11 = vpop.f32.mrf.mxu0  ;;  %v1383_v24 = vadd.f32 %v1382_v6, %v258_v22 }
 0x156   :  { %v1384_v12 = vpop.f32.mrf.mxu1  ;;  %v1470_v13 = vmax.f32 %v1342_v7, 0.0  ;;  %v1473_v18 = vpack.c.bf16 %v1469_v8, %v1469_v8 }
 0x157   :  { %v1344_v14 = vpop.f32.mrf.mxu0 }
 0x158   :  { %v1385_v15 = vpop.f32.mrf.mxu1  ;;  %v1474_v16 = vpack.c.bf16 %v1470_v13, %v1470_v13 }
 0x15a   :  { %1772 = vmatprep.mubr.bf16.mxu0 %v1474_v16 }
 0x15b   :  { %1773 = vmatmul.mubr.bf16.vlgmr.msra.gmra.mxu0 %v1473_v18 }
 0x191   :  { %v1421_v10 = vpop.f32.mrf.mxu0 }
 0x192   :  { %v1462_v17 = vpop.f32.mrf.mxu1  ;;  %v1422_v25 = vadd.f32 %v1421_v10, %v1381_v23 }
 0x193   :  { %v1423_v26 = vpop.f32.mrf.mxu0 }
 0x194   :  { %v1464_v27 = vpop.f32.mrf.mxu1  ;;  %v1463_v28 = vadd.f32 %v1462_v17, %v1422_v25  ;;  %v1424_v29 = vadd.f32 %v1423_v26, %v1383_v24 }
 0x195   :  { %v1425_v30 = vpop.f32.mrf.mxu0 }
 0x196   :  { %v1466_v9 = vpop.f32.mrf.mxu1  ;;  %v1465_v31 = vadd.f32 %v1464_v27, %v1424_v29  ;;  %v1471_v32 = vmax.f32 %v1463_v28, 0.0 }
 0x197   :  { %v1426_v33 = vpop.f32.mrf.mxu0 }
 0x198   :  { %v1467_v34 = vpop.f32.mrf.mxu1  ;;  %v1472_v35 = vmax.f32 %v1465_v31, 0.0  ;;  %v1475_v36 = vpack.c.bf16 %v1471_v32, %v1471_v32 }
 0x19a   :  { %v1476_v53 = vpack.c.bf16 %v1472_v35, %v1472_v35 }
 0x19c   :  { %1812 = vmatprep.mubr.bf16.mxu1 %v1476_v53 }
 0x19d   :  { %1813 = vmatmul.mubr.bf16.vlgmr.msra.gmra.mxu1 %v1475_v36 }
 0x21b   :  { %v2094_v37 = vpop.f32.mrf.mxu0 }
 0x21d   :  { %v2095_v38 = vpop.f32.mrf.mxu0 }
 0x21e   :  { %v2096_v39 = vadd.f32 %v2095_v38, %v2094_v37 }
 0x21f   :  { %v2097_v40 = vpop.f32.mrf.mxu0 }
 0x220   :  { %v1775_v45 = vadd.f32 %v2096_v39, %v2045_v42 }
 0x221   :  { %v2098_v41 = vpop.f32.mrf.mxu0 }
 0x25d   :  { %v2116_v43 = vpop.f32.mrf.mxu1 }
 0x25f   :  { %v2117_v44 = vpop.f32.mrf.mxu1 }
 0x260   :  { %v2118_v46 = vadd.f32 %v2117_v44, %v2116_v43 }
 0x261   :  { %v2119_v47 = vpop.f32.mrf.mxu1 }
 0x262   :  { %v1815_v48 = vadd.f32 %v2118_v46, %v1775_v45 }
 0x263   :  { %v2120_v49 = vpop.f32.mrf.mxu1 }
 0x264   :  { %v1820_v50 = vand.u32 2147483647, %v1815_v48  ;;  %v1838_v59 = vsub.f32 0.0, %v1815_v48  ;;  %v1833_v63 = vmax.f32 %v1815_v48, 0.0 }
 0x266   :  { %v1821_v51 = vsub.f32 0.0, %v1820_v50  ;;  %v1839_v0 = vmax.f32 %v1838_v59, 0.0 }
 0x268   :  { %v1822_v52 = vmul.f32 1.442695, %v1821_v51 }
 0x26a   :  { %2446 = vpow2.f32 %v1822_v52 }
 0x277   :  { %v2447_v54 = vpop.eup %2446 }
 0x278   :  { %v1824_v55 = vadd.f32 1.0, %v2447_v54  ;;  %v1827_v56 = vmul.f32 -0.5, %v2447_v54  ;;  %v1830_v58 = vand.u32 2147483647, %v2447_v54 }
 0x27a   :  { %2448 = vlog2.f32 %v1824_v55  ;;  %v1828_v57 = vadd.f32 1.0, %v1827_v56  ;;  %vm1831_vm0 = vcmp.lt.f32.partialorder %v1830_v58, 0.0004427343 }
 0x27c   :  { %v1829_v62 = vmul.f32 %v2447_v54, %v1828_v57 }
 0x287   :  { %v2449_v60 = vpop.eup %2448 }
 0x288   :  { %v1826_v61 = vmul.f32 0.6931472, %v2449_v60 }
 0x28a   :  { %v1832_v1 = vsel %vm1831_vm0, %v1829_v62, %v1826_v61 }
 0x28b   :  { %v1834_v2 = vadd.f32 %v1833_v63, %v1832_v1  ;;  %v1840_v3 = vadd.f32 %v1839_v0, %v1832_v1 }
 0x28d   :  { %v1835_v4 = vsub.f32 0.0, %v1834_v2  ;;  %v1841_v5 = vsub.f32 0.0, %v1840_v3 }
 0x28f   :  { %1843 = vrot.lane.b32.xlu0 %v1841_v5, %s2475_s2  ;;  %1837 = vst.msk [vmem:[%s2664_s5] sm:$0xff] %vm1836_vm1, %v1835_v4 }
 0x301   :  { %v1844_v6 = vpop.permute.xlu0 %1843 }
 0x302   :  { %1847 = vst.msk [vmem:[%s2664_s5] sm:$0xff] %vm1846_vm2, %v1844_v6 }
 0x303   :  { %1852 = vsyncpa [#allocation4], 1 }

</bundles_post_ra>
